<compile_context>
chip_gen: v6e
topology: v6e:2x2x1
jax: 0.10.0
libtpu: 0.0.40
codegen_flags: <defaults>
</compile_context>

<pallas_src>
import math
import functools

import jax
import jax.numpy as jnp
from jax.experimental import pallas as pl
from jax.experimental.pallas import tpu as pltpu


def make_pe_table(embedding_dim: int, max_len: int) -> jnp.ndarray:
    """Deterministic positional-encoding buffer, identical math to the module."""
    position = jnp.arange(max_len, dtype=jnp.float32)[:, None]           # [max_len, 1]
    div_term = jnp.exp(
        jnp.arange(0, embedding_dim, 2, dtype=jnp.float32)
        * (-math.log(10000.0) / embedding_dim)
    )                                                                     # [emb/2]
    pe = jnp.zeros((max_len, embedding_dim), dtype=jnp.float32)
    pe = pe.at[:, 0::2].set(jnp.sin(position * div_term))
    pe = pe.at[:, 1::2].set(jnp.cos(position * div_term))
    return pe                                                             # [max_len, emb]


# ----------------------------- kernels ------------------------------------ #

def _posenc_eval_kernel(x_ref, pe_ref, o_ref):
    # x_ref: (BT, CHUNK), pe_ref: (1, CHUNK) broadcasts over the batch rows.
    o_ref[...] = (x_ref[...] + pe_ref[...]).astype(o_ref.dtype)


def _posenc_train_kernel(x_ref, pe_ref, bits_ref, o_ref, *, threshold, inv_keep):
    # Inverted-scaling dropout after the positional add (nn.Dropout training
    # mode).  Integer-threshold compare on raw uint32 bits: exact keep
    # probability, no uint32->f32 convert, one multiply.
    y = x_ref[...] + pe_ref[...]
    keep = bits_ref[...] < jnp.uint32(threshold)
    o_ref[...] = jnp.where(keep, y * inv_keep, jnp.zeros_like(y)).astype(o_ref.dtype)


# ----------------------------- tiling ------------------------------------- #

def _pick_tiles(batch, flat, itemsize, target_bytes=2 * 1024 * 1024):
    """Pick a (BT, CHUNK) tile: lane-dense last dim, ~target_bytes per tile."""
    # Lane (last) axis: multiple of 128, or the full extent if unaligned.
    if flat % 128 == 0:
        per_row = max(128, (target_bytes // (8 * itemsize)) // 128 * 128)
        chunk = min(flat, per_row)
    else:
        chunk = flat
    # Sublane (batch) axis: full extent for small batches, else a multiple of 8
    # sized so BT * CHUNK stays around target_bytes.
    if batch <= 8:
        bt = batch
    else:
        rows = max(8, (target_bytes // (chunk * itemsize)) // 8 * 8)
        bt = max(8, min((batch // 8) * 8, rows))
    return bt, chunk


# ----------------------------- wrapper ------------------------------------ #

@functools.partial(jax.jit, static_argnames=("dropout_p", "training"))
def positional_encoding(x, pe_table, rng_key, *, dropout_p=0.1, training=False):
    """x: [batch, seq, emb]. Returns same shape/dtype as x."""
    B, S, E = x.shape
    F = S * E

    # Flatten (seq, emb) -> lane-dense last dim; pe cast to activation dtype.
    xf = x.reshape(B, F)
    pe = pe_table[:S].astype(x.dtype).reshape(1, F)

    bt, chunk = _pick_tiles(B, F, x.dtype.itemsize)
    grid = (pl.cdiv(B, bt), pl.cdiv(F, chunk))

    x_spec = pl.BlockSpec((bt, chunk), lambda i, j: (i, j))
    pe_spec = pl.BlockSpec((1, chunk), lambda i, j: (0, j))
    out_spec = pl.BlockSpec((bt, chunk), lambda i, j: (i, j))
    out_shape = jax.ShapeDtypeStruct((B, F), x.dtype)

    cparams = pltpu.CompilerParams(
        dimension_semantics=("parallel", "parallel"),   # both axes shard on v7x 2-TC
        vmem_limit_bytes=48 * 1024 * 1024,              # headroom, still < v7x 64 MiB
    )

    if not training or dropout_p == 0.0:
        out = pl.pallas_call(
            _posenc_eval_kernel,
            out_shape=out_shape,
            grid_spec=pltpu.PrefetchScalarGridSpec(
                num_scalar_prefetch=0,
                grid=grid,
                in_specs=[x_spec, pe_spec],
                out_specs=out_spec,
            ),
            compiler_params=cparams,
        )(xf, pe)
        return out.reshape(B, S, E)

    keep_prob = 1.0 - float(dropout_p)
    threshold = min(int(round(keep_prob * 2.0 ** 32)), 2 ** 32 - 1)
    # Random bits generated in plain JAX (works on TPU and in interpret mode).
    # TODO(synk): not bit-identical to torch's dropout RNG stream; derive a
    # fresh rng_key per call/layer to avoid correlated masks.
    bits = jax.random.bits(rng_key, (B, F), dtype=jnp.uint32)

    kernel = functools.partial(
        _posenc_train_kernel, threshold=threshold, inv_keep=1.0 / keep_prob
    )
    out = pl.pallas_call(
        kernel,
        out_shape=out_shape,
        grid_spec=pltpu.PrefetchScalarGridSpec(
            num_scalar_prefetch=0,
            grid=grid,
            in_specs=[x_spec, pe_spec, x_spec],  # bits tile exactly like x
            out_specs=out_spec,
        ),
        compiler_params=cparams,
    )(xf, pe, bits)
    return out.reshape(B, S, E)


# ----------------------------- demo / check -------------------------------- #

if __name__ == "__main__":
    # Small shapes consistent with the module's forward: [batch, seq, emb].
    batch, seq, emb, max_len = 2, 8, 32, 64

    key = jax.random.PRNGKey(0)
    kx, kdrop = jax.random.split(key)
    x = jax.random.normal(kx, (batch, seq, emb), dtype=jnp.float32)
    pe_table = make_pe_table(emb, max_len)

    # Eval-mode forward (dropout is identity), matches PyTorch module.eval().
    out = positional_encoding(x, pe_table, kdrop, dropout_p=0.1, training=False)
    out = jax.block_until_ready(out)

    ref = x + pe_table[:seq][None, :, :]
    assert out.shape == (batch, seq, emb)
    assert jnp.allclose(out, ref, atol=1e-6), "eval mismatch vs reference"

    # Training-mode path: each element is either dropped (exactly 0) or the
    # positional-add result scaled by 1/keep_prob.
    keep_prob = 0.9
    out_train = positional_encoding(x, pe_table, kdrop, dropout_p=0.1, training=True)
    out_train = jax.block_until_ready(out_train)
    ok = (out_train == 0) | jnp.isclose(out_train * keep_prob, ref, atol=1e-5)
    assert bool(jnp.all(ok)), "train-mode dropout invariant violated"

    print("KERNEL_OK")
</pallas_src>

<mosaic_0001>
module attributes {stable_mosaic.version = 11 : i64} {
  func.func @_posenc_eval_kernel(%arg0: i32, %arg1: i32, %arg2: memref<2x256xf32, #tpu.memory_space<vmem>>, %arg3: memref<1x256xf32, #tpu.memory_space<vmem>>, %arg4: memref<2x256xf32, #tpu.memory_space<vmem>>) attributes {dimension_semantics = [#tpu.dimension_semantics<parallel>, #tpu.dimension_semantics<parallel>], iteration_bounds = array<i64: 1, 1>, scalar_prefetch = 0 : i64, scratch_operands = 0 : i64, tpu.core_type = #tpu.core_type<tc>, window_params = [{transform_indices = @transform_0, window_bounds = array<i64: 2, 256>}, {transform_indices = @transform_1, window_bounds = array<i64: 1, 256>}, {transform_indices = @transform_2, window_bounds = array<i64: 2, 256>}]} {
    %c0 = arith.constant 0 : index
    %c0_0 = arith.constant 0 : index
    %0 = vector.load %arg2[%c0, %c0_0] : memref<2x256xf32, #tpu.memory_space<vmem>>, vector<2x256xf32>
    %c0_1 = arith.constant 0 : index
    %c0_2 = arith.constant 0 : index
    %1 = vector.load %arg3[%c0_1, %c0_2] : memref<1x256xf32, #tpu.memory_space<vmem>>, vector<1x256xf32>
    %2 = vector.broadcast %1 : vector<1x256xf32> to vector<2x256xf32>
    %3 = arith.addf %0, %2 : vector<2x256xf32>
    %c0_3 = arith.constant 0 : index
    %c0_4 = arith.constant 0 : index
    %4 = vector.load %arg4[%c0_3, %c0_4] : memref<2x256xf32, #tpu.memory_space<vmem>>, vector<2x256xf32>
    tpu.vector_store %arg4[%c0_3, %c0_4], %3 {strides = array<i32>} : memref<2x256xf32, #tpu.memory_space<vmem>>, vector<2x256xf32>,
    return
  }
  func.func @transform_0(%arg0: i32, %arg1: i32) -> (i32, i32) {
    %c0_i32 = arith.constant 0 : i32
    return %arg0, %arg1 : i32, i32
  }
  func.func @transform_1(%arg0: i32, %arg1: i32) -> (i32, i32) {
    %c0_i32 = arith.constant 0 : i32
    %c0_i32_0 = arith.constant 0 : i32
    return %c0_i32, %arg1 : i32, i32
  }
  func.func @transform_2(%arg0: i32, %arg1: i32) -> (i32, i32) {
    %c0_i32 = arith.constant 0 : i32
    return %arg0, %arg1 : i32, i32
  }
}

</mosaic_0001>

<bundles_post_ra>
// kernel: positional_encoding.1
= control target key start
LH: loop header
LB: loop body
LE: loop exit
PB: predicated region body
PF: predicated region fallthrough
CT: control target
= control target key end

     0   :  { %v14_v0 = vlaneseq  ;;  %v38_v1 = vmov 1983009808   ;;  %s63_s1 = inlined_call_operand.vmem [shape: f32[1,256], index: 1, kind: input, shape index: {}]   ;;  %s64_s0 = inlined_call_operand.vmem [shape: f32[2,256], index: 0, kind: input, shape index: {}]   ;;  %s65_s2 = inlined_call_operand.vmem [shape: f32[2,256], index: 2, kind: output, shape index: {}]  }
   0x1   :  { %v24_v2 = vunpack.c.l.s4 %v38_v1  ;;  %v12_v4 = vld [vmem:[%s63_s1] sm:$0x3] }
   0x2   :  { %v15_v3 = vshrl.u32 %v14_v0, 7  ;;  %v11_v12 = vld [vmem:[%s64_s0] sm:$0xf] }
   0x3   :  { %v25_v5 = vunpack.c.0.s8 %v24_v2 }
   0x4   :  { %v16_v6 = vsub.s32 0, %v15_v3  ;;  %v20_v7 = vsub.s32 1, %v15_v3 }
   0x5   :  { %v28_v10 = vsub.s32 %v25_v5, %v15_v3 }
   0x6   :  { %v17_v8 = vrot.slane %v12_v4, %v16_v6  ;;  %v21_v9 = vrot.slane %v12_v4, %v20_v7 }
   0x8   :  { %v22_v11 = vcombine.low %v17_v8, %v21_v9 }
   0xa   :  { %v29_v13 = vrot.slane %v22_v11, %v28_v10 }
   0xc   :  { %v31_v14 = vadd.f32 %v29_v13, %v11_v12 }
   0xe   :  { %32 = vst [vmem:[%s65_s2] sm:$0xf] %v31_v14 }

</bundles_post_ra>
